<compile_context>
chip_gen: v5e
topology: v5e:2x2
jax: 0.10.0
libtpu: 0.0.40
codegen_flags: <defaults>
</compile_context>

<pallas_src>
import jax
import jax.numpy as jnp
from jax.experimental import pallas as pl
from jax.experimental.pallas import tpu as pltpu


def _self_attention_kernel(x_ref, w_ref, b_ref, o_ref):
    """One grid step processes a block of `bb` batch elements.

    x_ref : (bb, N, C)   input slab (native dtype -> native MXU rate)
    w_ref : (C, 3C)      fused, pre-transposed [Wq*scale | Wk | Wv]
    b_ref : (1, 3C)      fused bias [bq*scale | bk | bv] (f32)
    o_ref : (bb, N, C)
    """
    xb = x_ref[...]                                   # (bb, N, C)
    bb, n, c = xb.shape

    # Fused QKV projection: one wide matmul over all rows in the block,
    # f32 accumulation via preferred_element_type.
    x2 = xb.reshape(bb * n, c)
    qkv = jnp.dot(x2, w_ref[...], preferred_element_type=jnp.float32)
    qkv = (qkv + b_ref[...]).reshape(bb, n, 3 * c)    # (bb, N, 3C) f32

    # Slice Q/K/V; cast back to the input dtype so the attention matmuls run
    # at native (e.g. bf16) MXU rate.  1/sqrt(C) is already folded into Wq/bq.
    q = qkv[:, :, :c].astype(xb.dtype)
    k = qkv[:, :, c:2 * c].astype(xb.dtype)
    v = qkv[:, :, 2 * c:].astype(xb.dtype)

    # Batched 'NT' matmul: contract the channel dims directly (no k.T copy).
    scores = jnp.einsum("bqc,bkc->bqk", q, k,
                        preferred_element_type=jnp.float32)    # (bb, N, N)

    # Softmax over the key axis (PyTorch Softmax(dim=2)), in f32.
    m = jnp.max(scores, axis=-1, keepdims=True)
    e = jnp.exp(scores - m)
    denom = jnp.sum(e, axis=-1, keepdims=True)
    attn = (e * pl.reciprocal(denom, approx=True)).astype(xb.dtype)

    weighted = jnp.einsum("bqk,bkc->bqc", attn, v,
                          preferred_element_type=jnp.float32)  # (bb, N, C)
    o_ref[...] = weighted.astype(o_ref.dtype)


def self_attention(x, wq, bq, wk, bk, wv, bv, *, block_b=None):
    """x: (B, N, C); w*: (C, C) torch-layout (out, in); b*: (C,). Returns (B, N, C)."""
    B, N, C = x.shape
    scale = 1.0 / (float(C) ** 0.5)

    # Host-side prep: pre-transpose to (in, out), fold the 1/sqrt(C) scale into
    # the query projection, and fuse Q/K/V into one weight / one bias array.
    w_fused = jnp.concatenate([wq.T * scale, wk.T, wv.T], axis=1).astype(x.dtype)   # (C, 3C)
    b_fused = jnp.concatenate([bq * scale, bk, bv]).reshape(1, 3 * C).astype(jnp.float32)

    if block_b is None:
        # Collapse as many batch elements as comfortably fit per grid step
        # (per-step overhead dominates at toy sizes); fall back toward 1 if big.
        per_batch_bytes = (2 * N * C * x.dtype.itemsize      # x + out (native)
                           + 3 * N * C * 4                   # qkv (f32)
                           + 2 * N * N * 4)                  # scores + exp (f32)
        block_b = max(1, min(B, (8 << 20) // max(per_batch_bytes, 1)))
    block_b = max(1, min(block_b, B))
    while B % block_b:
        block_b -= 1
    grid = (B // block_b,)

    # Advisory cost hint for XLA's scheduler around the custom call.
    flops = 2 * B * N * C * (3 * C) + 2 * 2 * B * N * N * C
    bytes_accessed = (2 * B * N * C * x.dtype.itemsize
                      + w_fused.size * w_fused.dtype.itemsize
                      + b_fused.size * 4)
    cost = pl.CostEstimate(flops=flops, transcendentals=B * N * N,
                           bytes_accessed=bytes_accessed)

    # TODO(synk): for long sequences, add flash-style query/key grid tiling with
    # an online-softmax accumulator instead of materializing the (N, N) scores.
    return pl.pallas_call(
        _self_attention_kernel,
        out_shape=jax.ShapeDtypeStruct((B, N, C), x.dtype),
        grid_spec=pltpu.PrefetchScalarGridSpec(
            num_scalar_prefetch=0,
            grid=grid,
            in_specs=[
                pl.BlockSpec((block_b, N, C), lambda i: (i, 0, 0)),   # x
                pl.BlockSpec((C, 3 * C), lambda i: (0, 0)),           # fused W (constant)
                pl.BlockSpec((1, 3 * C), lambda i: (0, 0)),           # fused b (constant)
            ],
            out_specs=pl.BlockSpec((block_b, N, C), lambda i: (i, 0, 0)),
        ),
        compiler_params=pltpu.CompilerParams(
            dimension_semantics=("parallel",)),
        cost_estimate=cost,
    )(x, w_fused, b_fused)


def _reference(x, wq, bq, wk, bk, wv, bv):
    q = jnp.einsum("bnc,oc->bno", x, wq) + bq
    k = jnp.einsum("bnc,oc->bno", x, wk) + bk
    v = jnp.einsum("bnc,oc->bno", x, wv) + bv
    scores = jnp.einsum("bnc,bmc->bnm", q, k) / (x.shape[-1] ** 0.5)
    attn = jax.nn.softmax(scores, axis=-1)
    return jnp.einsum("bnm,bmc->bnc", attn, v)


if __name__ == "__main__":
    B, N, C = 2, 8, 32
    key = jax.random.PRNGKey(0)
    kx, kq, kk, kv, kbq, kbk, kbv = jax.random.split(key, 7)

    x = jax.random.normal(kx, (B, N, C), dtype=jnp.float32)
    # Deterministic synthetic parameters (shapes match nn.Linear(input_dim, input_dim)).
    bound = 1.0 / (C ** 0.5)
    wq = jax.random.uniform(kq, (C, C), jnp.float32, -bound, bound)
    wk = jax.random.uniform(kk, (C, C), jnp.float32, -bound, bound)
    wv = jax.random.uniform(kv, (C, C), jnp.float32, -bound, bound)
    bq = jax.random.uniform(kbq, (C,), jnp.float32, -bound, bound)
    bk = jax.random.uniform(kbk, (C,), jnp.float32, -bound, bound)
    bv = jax.random.uniform(kbv, (C,), jnp.float32, -bound, bound)

    out = jax.block_until_ready(self_attention(x, wq, bq, wk, bk, wv, bv))
    ref = _reference(x, wq, bq, wk, bk, wv, bv)

    assert out.shape == (B, N, C)
    # Tolerance loosened slightly for the approx (EUP) softmax reciprocal.
    assert jnp.allclose(out, ref, atol=2e-3, rtol=2e-3), "mismatch vs reference"
    print("KERNEL_OK")
</pallas_src>

<mosaic_0001>
module attributes {stable_mosaic.version = 11 : i64} {
  func.func @_self_attention_kernel(%arg0: i32, %arg1: memref<2x8x32xf32, #tpu.memory_space<vmem>>, %arg2: memref<32x96xf32, #tpu.memory_space<vmem>>, %arg3: memref<1x96xf32, #tpu.memory_space<vmem>>, %arg4: memref<2x8x32xf32, #tpu.memory_space<vmem>>) attributes {dimension_semantics = [#tpu.dimension_semantics<parallel>], iteration_bounds = array<i64: 1>, scalar_prefetch = 0 : i64, scratch_operands = 0 : i64, tpu.core_type = #tpu.core_type<tc>, window_params = [{transform_indices = @transform_0, window_bounds = array<i64: 2, 8, 32>}, {pipeline_mode = #tpu.pipeline_mode<synchronous>, transform_indices = @transform_1, window_bounds = array<i64: 32, 96>}, {pipeline_mode = #tpu.pipeline_mode<synchronous>, transform_indices = @transform_2, window_bounds = array<i64: 1, 96>}, {transform_indices = @transform_3, window_bounds = array<i64: 2, 8, 32>}]} {
    %c0 = arith.constant 0 : index
    %c0_0 = arith.constant 0 : index
    %c0_1 = arith.constant 0 : index
    %0 = vector.load %arg1[%c0, %c0_0, %c0_1] : memref<2x8x32xf32, #tpu.memory_space<vmem>>, vector<2x8x32xf32>
    %1 = vector.shape_cast %0 : vector<2x8x32xf32> to vector<16x32xf32>
    %c0_2 = arith.constant 0 : index
    %c0_3 = arith.constant 0 : index
    %2 = vector.load %arg2[%c0_2, %c0_3] : memref<32x96xf32, #tpu.memory_space<vmem>>, vector<32x96xf32>
    %cst = arith.constant dense<0.000000e+00> : vector<16x96xf32>
    %3 = tpu.matmul %1, %2, %cst {dimension_numbers = #tpu.dot_dimension_numbers<[1], [0], [0], [1], [0, 0, 1, 1], [], []>} : vector<16x32xf32>, vector<32x96xf32>, vector<16x96xf32> -> vector<16x96xf32>
    %c0_4 = arith.constant 0 : index
    %c0_5 = arith.constant 0 : index
    %4 = vector.load %arg3[%c0_4, %c0_5] : memref<1x96xf32, #tpu.memory_space<vmem>>, vector<1x96xf32>
    %5 = vector.broadcast %4 : vector<1x96xf32> to vector<16x96xf32>
    %6 = arith.addf %3, %5 : vector<16x96xf32>
    %7 = vector.shape_cast %6 : vector<16x96xf32> to vector<2x8x96xf32>
    %8 = vector.extract_strided_slice %7 {offsets = [0, 0, 0], sizes = [2, 8, 32], strides = [1, 1, 1]} : vector<2x8x96xf32> to vector<2x8x32xf32>
    %9 = vector.extract_strided_slice %7 {offsets = [0, 0, 32], sizes = [2, 8, 32], strides = [1, 1, 1]} : vector<2x8x96xf32> to vector<2x8x32xf32>
    %10 = vector.extract_strided_slice %7 {offsets = [0, 0, 64], sizes = [2, 8, 32], strides = [1, 1, 1]} : vector<2x8x96xf32> to vector<2x8x32xf32>
    "tpu.trace_start"() <{level = 10 : i32, message = "bqc,bkc->bqk"}> : () -> ()
    %cst_6 = arith.constant dense<0.000000e+00> : vector<2x8x8xf32>
    %11 = tpu.matmul %8, %9, %cst_6 {dimension_numbers = #tpu.dot_dimension_numbers<[2], [2], [1], [1], [0, 0, 0, 1, 1, 1], [0], [0]>} : vector<2x8x32xf32>, vector<2x8x32xf32>, vector<2x8x8xf32> -> vector<2x8x8xf32>
    "tpu.trace_stop"() : () -> ()
    %cst_7 = arith.constant dense<0xFF800000> : vector<2x8xf32>
    %12 = vector.multi_reduction <maximumf>, %11, %cst_7 [2] : vector<2x8x8xf32> to vector<2x8xf32>
    %13 = vector.shape_cast %12 : vector<2x8xf32> to vector<2x8x1xf32>
    %14 = vector.broadcast %13 : vector<2x8x1xf32> to vector<2x8x8xf32>
    %15 = arith.subf %11, %14 : vector<2x8x8xf32>
    %16 = math.exp %15 : vector<2x8x8xf32>
    %cst_8 = arith.constant dense<0.000000e+00> : vector<2x8xf32>
    %17 = vector.multi_reduction <add>, %16, %cst_8 [2] : vector<2x8x8xf32> to vector<2x8xf32>
    %18 = vector.shape_cast %17 : vector<2x8xf32> to vector<2x8x1xf32>
    %19 = tpu.reciprocal %18 {approx = true} : vector<2x8x1xf32> -> vector<2x8x1xf32>
    %20 = vector.broadcast %19 : vector<2x8x1xf32> to vector<2x8x8xf32>
    %21 = arith.mulf %16, %20 : vector<2x8x8xf32>
    "tpu.trace_start"() <{level = 10 : i32, message = "bqk,bkc->bqc"}> : () -> ()
    %cst_9 = arith.constant dense<0.000000e+00> : vector<2x8x32xf32>
    %22 = tpu.matmul %21, %10, %cst_9 {dimension_numbers = #tpu.dot_dimension_numbers<[2], [1], [1], [2], [0, 0, 0, 1, 1, 2], [0], [0]>} : vector<2x8x8xf32>, vector<2x8x32xf32>, vector<2x8x32xf32> -> vector<2x8x32xf32>
    "tpu.trace_stop"() : () -> ()
    %c0_10 = arith.constant 0 : index
    %c0_11 = arith.constant 0 : index
    %c0_12 = arith.constant 0 : index
    %23 = vector.load %arg4[%c0_10, %c0_11, %c0_12] : memref<2x8x32xf32, #tpu.memory_space<vmem>>, vector<2x8x32xf32>
    tpu.vector_store %arg4[%c0_10, %c0_11, %c0_12], %22 {strides = array<i32>} : memref<2x8x32xf32, #tpu.memory_space<vmem>>, vector<2x8x32xf32>,
    return
  }
  func.func @transform_0(%arg0: i32) -> (i32, i32, i32) {
    %c0_i32 = arith.constant 0 : i32
    %c0_i32_0 = arith.constant 0 : i32
    %c0_i32_1 = arith.constant 0 : i32
    return %arg0, %c0_i32, %c0_i32_0 : i32, i32, i32
  }
  func.func @transform_1(%arg0: i32) -> (i32, i32) {
    %c0_i32 = arith.constant 0 : i32
    %c0_i32_0 = arith.constant 0 : i32
    %c0_i32_1 = arith.constant 0 : i32
    return %c0_i32, %c0_i32_0 : i32, i32
  }
  func.func @transform_2(%arg0: i32) -> (i32, i32) {
    %c0_i32 = arith.constant 0 : i32
    %c0_i32_0 = arith.constant 0 : i32
    %c0_i32_1 = arith.constant 0 : i32
    return %c0_i32, %c0_i32_0 : i32, i32
  }
  func.func @transform_3(%arg0: i32) -> (i32, i32, i32) {
    %c0_i32 = arith.constant 0 : i32
    %c0_i32_0 = arith.constant 0 : i32
    %c0_i32_1 = arith.constant 0 : i32
    return %arg0, %c0_i32, %c0_i32_0 : i32, i32, i32
  }
}

</mosaic_0001>

<bundles_post_ra>
// kernel: tpu_custom_call.1
= control target key start
LH: loop header
LB: loop body
LE: loop exit
PB: predicated region body
PF: predicated region fallthrough
CT: control target
= control target key end

     0   :  { %8 = vsyncpa [#allocation3], 0  ;;  %s402_s0 = inlined_call_operand.hbm [shape: f32[2,8,32], index: 0, kind: input, shape index: {}]   ;;  %s403_s1 = inlined_call_operand.hbm [shape: f32[32,96], index: 1, kind: input, shape index: {}]   ;;  %s404_s2 = inlined_call_operand.vmem [shape: f32[1,96], index: 2, kind: input, shape index: {}]   ;;  %s405_s3 = inlined_call_operand.hbm [shape: f32[2,8,32], index: 3, kind: output, shape index: {}]  }
   0x1   :  { %9 = vsyncpa [#allocation6], 0 }
   0x2   :  { %10 = vsyncpa [#allocation4], 0  ;;  %s15_s14 = sshll.u32 %s402_s0, 4  ;;  %s340_s15 = smov [#allocation2]   ;;  %s16_s14 = int_to_ptr.hbm [resolvable:$true] %s15_s14 }
   0x3   :  { %s17_s16 = sshll.u32 %s340_s15, 4  ;;  %s28_s19 = sshll.u32 %s403_s1, 4  ;;  %s18_s16 = int_to_ptr.vmem [resolvable:$true] %s17_s16  ;;  %s29_s19 = int_to_ptr.hbm [resolvable:$true] %s28_s19 }
   0x4   :  { %s341_s20 = smov 128   ;;  %s342_s21 = smov 8  }
   0x5   :  { %23 = dma.hbm_to_vmem [thread:$0]  %s16_s14, 256, %s18_s16, [#allocation3], %s341_s20, %s341_s20, %s342_s21  }
   0x6   :  { %s343_s22 = smov [#allocation5]  }
   0x7   :  { %s30_s23 = sshll.u32 %s343_s22, 4  ;;  %s31_s23 = int_to_ptr.vmem [resolvable:$true] %s30_s23 }
   0x8   :  { %36 = dma.hbm_to_vmem [thread:$0]  %s29_s19, 512, %s31_s23, [#allocation6], %s341_s20, %s341_s20, %s342_s21  }
   0x9   :  { %334 = dma.done.wait [#allocation3], 256  }
   0xa   :  { %335 = vsyncadd [#allocation3], 4294967040 }
   0xb   :  { %336 = dma.done.wait [#allocation6], 512  }
   0xc   :  { %337 = vsyncadd [#allocation6], 4294966784  ;;  %v52_v0 = vld [vmem:[#allocation5 + $0x18] sm:$0xff]  ;;  %v51_v1 = vld [vmem:[#allocation5 + $0x10] sm:$0xff]  ;;  %vm57_vm0 = vcmask 261120   ;;  %s344_s24 = smov 96  }
   0xd   :  { %76 = vmatpush.msra.mxu0 %v52_v0  ;;  %v50_v2 = vld [vmem:[#allocation5 + $0x8] sm:$0xff]  ;;  %v49_v3 = vld [vmem:[#allocation5] sm:$0xff]  ;;  %v47_v4 = vld [vmem:[#allocation2] sm:$0xff]  ;;  %s345_s25 = smov 64   ;;  %vm141_vm1 = vcmask 64512   ;;  %s224_s29 = sshll.u32 %s405_s3, 4  ;;  %s225_s29 = int_to_ptr.hbm [resolvable:$true] %s224_s29 }
   0xe   :  { %v48_v5 = vld [vmem:[#allocation2 + $0x8] sm:$0xff]  ;;  %v253_v6 = vld [vmem:[%s404_s2] ss:$0 sm:$0xff]  ;;  %s346_s2 = smov [#allocation7]  }
   0xf   :  { %77 = vmatpush.msra.mxu0 %v51_v1  ;;  %s222_s26 = sshll.u32 %s346_s2, 4  ;;  %s223_s26 = int_to_ptr.vmem [resolvable:$true] %s222_s26 }
  0x11   :  { %78 = vmatpush.msra.mxu0 %v50_v2 }
  0x13   :  { %79 = vmatpush.msra.mxu0 %v49_v3 }
  0x14   :  { %238 = vmatmul.msk.f32.vlgmr.msra.gmra.mxu0 %vm57_vm0, %v47_v4 }
  0x1c   :  { %239 = vmatmul.msk.f32.gmra.mxu0 %vm57_vm0, %v48_v5 }
  0x91   :  { %v81_v7 = vpop.f32.mrf.mxu0 }
  0x92   :  { %v82_v8 = vadd.f32 %v253_v6, %v81_v7 }
  0x94   :  { %88 = vrot.lane.b32.xlu0 %v82_v8, %s344_s24 }
  0x99   :  { %v84_v9 = vpop.f32.mrf.mxu0 }
  0x9a   :  { %v85_v10 = vadd.f32 %v253_v6, %v84_v9 }
  0x9c   :  { %115 = vrot.lane.b32.xlu0 %v85_v10, %s344_s24 }
  0xa4   :  { %164 = vrot.lane.b32.xlu0 %v82_v8, %s345_s25 }
 0x106   :  { %v89_v11 = vpop.permute.xlu0 %88 }
 0x107   :  { %240 = vmatpush.xpose.msk.msra.mxu1 %vm57_vm0, %v89_v11 }
 0x10a   :  { %241 = vmatmul.msk.f32.vlgmr.msra.gmra.mxu1 %vm57_vm0, %v82_v8 }
 0x10e   :  { %v116_v12 = vpop.permute.xlu0 %115 }
 0x10f   :  { %242 = vmatpush.xpose.msk.msra.mxu2 %vm57_vm0, %v116_v12 }
 0x112   :  { %243 = vmatmul.msk.f32.vlgmr.msra.gmra.mxu2 %vm57_vm0, %v85_v10 }
 0x116   :  { %v165_v13 = vpop.permute.xlu0 %164 }
 0x117   :  { %185 = vmatpush.msra.mxu3 %v165_v13 }
 0x187   :  { %v111_v14 = vpop.f32.mrf.mxu1 }
 0x188   :  { %v142_v15 = vsel %vm141_vm1, %v111_v14, -inf }
 0x189   :  { %143 = vmax.xlane.f32.xlu1 %v142_v15 }
 0x195   :  { %v138_v16 = vpop.f32.mrf.mxu2 }
 0x196   :  { %v145_v17 = vsel %vm141_vm1, %v138_v16, -inf }
 0x197   :  { %146 = vmax.xlane.f32.xlu1 %v145_v17 }
 0x1b0   :  { %190 = vrot.lane.b32.xlu1 %v85_v10, %s345_s25 }
 0x1fc   :  { %v144_v18 = vpop.xlane.xlu1 %143 }
 0x1fd   :  { %v148_v19 = vsub.f32 %v111_v14, %v144_v18 }
 0x1ff   :  { %v150_v20 = vmul.f32 1.442695, %v148_v19 }
 0x201   :  { %254 = vpow2.f32 %v150_v20 }
 0x207   :  { %v255_v21 = vpop.eup %254 }
 0x208   :  { %v154_v22 = vsel %vm141_vm1, %v255_v21, 0.0 }
 0x209   :  { %155 = vadd.xlane.f32.xlu2 %v154_v22 }
 0x20a   :  { %v147_v23 = vpop.xlane.xlu1 %146 }
 0x20b   :  { %v149_v24 = vsub.f32 %v138_v16, %v147_v23 }
 0x20d   :  { %v152_v25 = vmul.f32 1.442695, %v149_v24 }
 0x20f   :  { %256 = vpow2.f32 %v152_v25 }
 0x215   :  { %v257_v26 = vpop.eup %256 }
 0x216   :  { %v157_v27 = vsel %vm141_vm1, %v257_v26, 0.0 }
 0x217   :  { %158 = vadd.xlane.f32.xlu2 %v157_v27 }
 0x222   :  { %v191_v28 = vpop.permute.xlu1 %190 }
 0x223   :  { %211 = vmatpush.msrb.mxu3 %v191_v28 }
 0x27c   :  { %v156_v29 = vpop.xlane.xlu2 %155 }
 0x27d   :  { %258 = vrcp.f32 %v156_v29 }
 0x283   :  { %v259_v30 = vpop.eup %258 }
 0x284   :  { %v162_v31 = vmul.f32 %v259_v30, %v255_v21 }
 0x286   :  { %244 = vmatmul.msk.f32.vlgmr.msra.gmra.mxu3 %vm141_vm1, %v162_v31 }
 0x28a   :  { %v159_v32 = vpop.xlane.xlu2 %158 }
 0x28b   :  { %260 = vrcp.f32 %v159_v32 }
 0x291   :  { %v261_v33 = vpop.eup %260 }
 0x292   :  { %v163_v34 = vmul.f32 %v261_v33, %v257_v26 }
 0x294   :  { %245 = vmatmul.msk.f32.vlgmr.msrb.gmra.mxu3 %vm141_vm1, %v163_v34 }
 0x309   :  { %v187_v35 = vpop.f32.mrf.mxu3 }
 0x30a   :  { %216 = vst.msk [vmem:[#allocation7] sm:$0xff] %vm57_vm0, %v187_v35 }
 0x317   :  { %v213_v36 = vpop.f32.mrf.mxu3 }
 0x318   :  { %217 = vst.msk [vmem:[#allocation7 + $0x8] sm:$0xff] %vm57_vm0, %v213_v36 }
 0x319   :  { %230 = dma.vmem_to_hbm [thread:$0]  %s223_s26, 256, %s225_s29, [#allocation4], %s341_s20, %s341_s20, %s342_s21  }
 0x31a   :  { %338 = dma.done.wait [#allocation4], 256  }
 0x31b   :  { %339 = vsyncadd [#allocation4], 4294967040 }
 0x31c   :  { %235 = vsyncpa [#allocation3], 1 }
 0x31d   :  { %236 = vsyncpa [#allocation6], 1 }
 0x31e   :  { %237 = vsyncpa [#allocation4], 1 }

</bundles_post_ra>
